<compile_context>
chip_gen: v7x
topology: tpu7x:2x2x1
jax: 0.10.0
libtpu: 0.0.40
codegen_flags: <defaults>
</compile_context>

<pallas_src>
import jax
import jax.numpy as jnp
from jax.experimental import pallas as pl
from jax.experimental.pallas import tpu as pltpu

# ---- "args" of the module (small, TPU-friendly sizes) ----
HIDDEN_DIM = 32
CLUSTER_NUM = 8
CODE_BOOK_LEN = 16
HALF = CLUSTER_NUM * CODE_BOOK_LEN // 2   # theta out dim   = 64
FULL = CLUSTER_NUM * CODE_BOOK_LEN        # theta_p out dim = 128
BATCH = 8
EPS = 1e-10
TEMP = 0.1


def _vmem():
    # whole (small) array resident in VMEM, no tiling
    return pl.BlockSpec(memory_space=pltpu.MemorySpace.VMEM)


# -------------------- single fused kernel --------------------
def _code_ae_kernel(x_ref, w1_ref, b1_ref, w2_ref, b2_ref, a_dec_ref, g_ref,
                    y_ref, rec_ref):
    f32 = jnp.float32

    # ---- Encoder MLP: h = tanh(x@W1+b1); pre = softplus(h@W2+b2) ----
    h = jnp.tanh(
        jnp.dot(x_ref[...], w1_ref[...], preferred_element_type=f32)
        + b1_ref[...])
    z = jnp.dot(h, w2_ref[...], preferred_element_type=f32) + b2_ref[...]
    pre = jax.nn.softplus(z)                       # (B, 128), lane-dense

    B = pre.shape[0]
    lane = jax.lax.broadcasted_iota(jnp.int32, (B, FULL), 1)
    # leader lane of cluster-group k (lanes 8k..8k+7) is lane 8k+7
    is_leader = (lane % CLUSTER_NUM) == (CLUSTER_NUM - 1)

    def _group_reduce_bcast(v, op):
        # Segmented reduce over each contiguous 8-lane cluster group, all XLU:
        #   forward roll tree: r[i] = op(v[i-7..i])  -> exact at leader 8k+7
        #   (non-leader windows wrap across groups/vector -> mask them out)
        r = op(v, pltpu.roll(v, shift=1, axis=1))
        r = op(r, pltpu.roll(r, shift=2, axis=1))
        r = op(r, pltpu.roll(r, shift=4, axis=1))
        ldr = jnp.where(is_leader, r, 0.0)
        #   reverse roll tree: b[i] = sum(ldr[i..i+7]); each cyclic 8-window
        #   holds exactly one leader (lane i's own group) -> exact broadcast.
        b = ldr + pltpu.roll(ldr, shift=FULL - 1, axis=1)   # shift -1
        b = b + pltpu.roll(b, shift=FULL - 2, axis=1)       # shift -2
        b = b + pltpu.roll(b, shift=FULL - 4, axis=1)       # shift -4
        return b

    def group_softmax(v, *, exact_recip):
        m = _group_reduce_bcast(v, jnp.maximum)              # exact group max
        e = jnp.exp(v - m)
        s = _group_reduce_bcast(e, jnp.add)                  # exact group sum
        if exact_recip:
            return e / s                                      # exact divide
        # EUP vrcp (free slot) + one Newton step -> ~f32-exact reciprocal
        r = pl.reciprocal(s, approx=True)
        r = r * (2.0 - s * r)
        return e * r

    # ---- softmax over clusters, then gumbel softmax (T = 0.1) ----
    # First softmax feeds log(p+eps)/T: a 10x error amplification, so use the
    # exact reciprocal here (review item 3).
    p = group_softmax(pre, exact_recip=True)                  # a_w
    xg = (jnp.log(p + EPS) + g_ref[...]) * jnp.float32(1.0 / TEMP)
    y = group_softmax(xg, exact_recip=False)                  # y_w, lane-dense

    # ---- Decoder: rec = y @ A ----
    # (For a large-batch v6e/v7x variant, cast y/A to bf16 here with
    #  preferred_element_type=f32; kept f32 at B=8 where the kernel is
    #  latency-bound and accuracy is free.)
    y_ref[...] = y
    rec_ref[...] = jnp.dot(y, a_dec_ref[...], preferred_element_type=f32)


@jax.jit
def code_ae_forward(x, params, gumbel_noise):
    """Fused CODE_AE forward. Returns (y_w, rec_emb)."""
    W1, b1, W2, b2, A = params
    B = x.shape[0]
    g_flat = gumbel_noise.reshape(B, FULL)       # metadata-only reshape

    y_flat, rec_emb = pl.pallas_call(
        _code_ae_kernel,
        out_shape=(jax.ShapeDtypeStruct((B, FULL), jnp.float32),
                   jax.ShapeDtypeStruct((B, HIDDEN_DIM), jnp.float32)),
        in_specs=[_vmem()] * 7,
        out_specs=(_vmem(), _vmem()),
    )(x, W1, b1, W2, b2, A, g_flat)

    # NOTE (large-batch deployment): the kernel at B=8 is dispatch/DMA-latency
    # bound, so the real lever is batching many forwards into one call:
    #   grid=(B // TB,) with batch-tiled x/g/y/rec BlockSpecs, constant
    #   index_maps for W1/b1/W2/b2/A (weights stay VMEM-resident),
    #   dimension_semantics=("parallel",) (engages both v7x TensorCores),
    #   TB ~ 1k-4k rows (≈2.5 KB/row double-buffered, fits every chip's scoped
    #   VMEM default), bf16 decoder matmul operands on v6e/v7x, and a padded
    #   lane-dense rec slab for unmasked stores.
    y_w = y_flat.reshape(B, CODE_BOOK_LEN, CLUSTER_NUM)   # metadata-only
    return y_w, rec_emb


def init_params(key):
    k1, k2, k3, k4, k5 = jax.random.split(key, 5)
    W1 = 0.1 * jax.random.normal(k1, (HIDDEN_DIM, HALF), jnp.float32)
    b1 = 0.1 * jax.random.normal(k2, (1, HALF), jnp.float32)
    W2 = 0.1 * jax.random.normal(k3, (HALF, FULL), jnp.float32)
    b2 = 0.1 * jax.random.normal(k4, (1, FULL), jnp.float32)
    A = 0.1 * jax.random.normal(k5, (FULL, HIDDEN_DIM), jnp.float32)
    return (W1, b1, W2, b2, A)


def code_ae_reference(x, params, gumbel_noise):
    """Pure-JAX reference (matches the PyTorch module)."""
    W1, b1, W2, b2, A = params
    hp = jax.lax.Precision.HIGHEST
    h = jnp.tanh(jnp.dot(x, W1, precision=hp) + b1)
    a = jax.nn.softplus(jnp.dot(h, W2, precision=hp) + b2)
    a = a.reshape(-1, CODE_BOOK_LEN, CLUSTER_NUM)
    a = jax.nn.softmax(a, axis=2)
    xg = (jnp.log(a + EPS) + gumbel_noise) / TEMP
    y = jax.nn.softmax(xg, axis=2)
    rec = jnp.dot(y.reshape(-1, FULL), A, precision=hp)
    return y, rec


if __name__ == "__main__":
    key = jax.random.PRNGKey(0)
    k_param, k_x, k_gumbel = jax.random.split(key, 3)

    params = init_params(k_param)
    x = jax.random.normal(k_x, (BATCH, HIDDEN_DIM), jnp.float32)

    # Gumbel noise (the PyTorch module samples this with .uniform_() on GPU;
    # here we sample it deterministically with a JAX key and pass it in).
    # TODO(synk): in-kernel sampling via pltpu.prng_* would also work but the
    # module's torch RNG has no exact Pallas equivalent, so noise is an input.
    u = jax.random.uniform(
        k_gumbel, (BATCH, CODE_BOOK_LEN, CLUSTER_NUM), jnp.float32,
        minval=0.0, maxval=1.0)
    gumbel = -jnp.log(-jnp.log(u + EPS) + EPS)

    y_w, rec_emb = jax.block_until_ready(code_ae_forward(x, params, gumbel))

    assert y_w.shape == (BATCH, CODE_BOOK_LEN, CLUSTER_NUM)
    assert rec_emb.shape == (BATCH, HIDDEN_DIM)
    # y_w rows are softmax distributions (NR-refined reciprocal -> tight sum).
    assert jnp.allclose(jnp.sum(y_w, axis=-1), 1.0, atol=1e-3)

    # Compare against the pure-JAX reference.  With the exact first-stage
    # reciprocal the temperature-amplified error is gone; tolerances are ~20x
    # tighter than the previous revision.
    y_ref, rec_ref = code_ae_reference(x, params, gumbel)
    assert jnp.allclose(y_w, y_ref, atol=1e-3, rtol=1e-3)
    assert jnp.allclose(rec_emb, rec_ref, atol=1e-3, rtol=1e-3)

    print("KERNEL_OK")
</pallas_src>

<mosaic_0001>
module attributes {stable_mosaic.version = 11 : i64} {
  func.func @_code_ae_kernel(%arg0: memref<8x32xf32, #tpu.memory_space<vmem>>, %arg1: memref<32x64xf32, #tpu.memory_space<vmem>>, %arg2: memref<1x64xf32, #tpu.memory_space<vmem>>, %arg3: memref<64x128xf32, #tpu.memory_space<vmem>>, %arg4: memref<1x128xf32, #tpu.memory_space<vmem>>, %arg5: memref<128x32xf32, #tpu.memory_space<vmem>>, %arg6: memref<8x128xf32, #tpu.memory_space<vmem>>, %arg7: memref<8x128xf32, #tpu.memory_space<vmem>>, %arg8: memref<8x32xf32, #tpu.memory_space<vmem>>) attributes {dimension_semantics = [], scalar_prefetch = 0 : i64, scratch_operands = 0 : i64, tpu.core_type = #tpu.core_type<tc>} {
    %c0 = arith.constant 0 : index
    %c0_0 = arith.constant 0 : index
    %0 = vector.load %arg0[%c0, %c0_0] : memref<8x32xf32, #tpu.memory_space<vmem>>, vector<8x32xf32>
    %c0_1 = arith.constant 0 : index
    %c0_2 = arith.constant 0 : index
    %1 = vector.load %arg1[%c0_1, %c0_2] : memref<32x64xf32, #tpu.memory_space<vmem>>, vector<32x64xf32>
    %cst = arith.constant dense<0.000000e+00> : vector<8x64xf32>
    %2 = tpu.matmul %0, %1, %cst {dimension_numbers = #tpu.dot_dimension_numbers<[1], [0], [0], [1], [0, 0, 1, 1], [], []>} : vector<8x32xf32>, vector<32x64xf32>, vector<8x64xf32> -> vector<8x64xf32>
    %c0_3 = arith.constant 0 : index
    %c0_4 = arith.constant 0 : index
    %3 = vector.load %arg2[%c0_3, %c0_4] : memref<1x64xf32, #tpu.memory_space<vmem>>, vector<1x64xf32>
    %4 = vector.broadcast %3 : vector<1x64xf32> to vector<8x64xf32>
    %5 = arith.addf %2, %4 : vector<8x64xf32>
    %6 = math.tanh %5 : vector<8x64xf32>
    %c0_5 = arith.constant 0 : index
    %c0_6 = arith.constant 0 : index
    %7 = vector.load %arg3[%c0_5, %c0_6] : memref<64x128xf32, #tpu.memory_space<vmem>>, vector<64x128xf32>
    %cst_7 = arith.constant dense<0.000000e+00> : vector<8x128xf32>
    %8 = tpu.matmul %6, %7, %cst_7 {dimension_numbers = #tpu.dot_dimension_numbers<[1], [0], [0], [1], [0, 0, 1, 1], [], []>} : vector<8x64xf32>, vector<64x128xf32>, vector<8x128xf32> -> vector<8x128xf32>
    %c0_8 = arith.constant 0 : index
    %c0_9 = arith.constant 0 : index
    %9 = vector.load %arg4[%c0_8, %c0_9] : memref<1x128xf32, #tpu.memory_space<vmem>>, vector<1x128xf32>
    %10 = vector.broadcast %9 : vector<1x128xf32> to vector<8x128xf32>
    %11 = arith.addf %8, %10 : vector<8x128xf32>
    %cst_10 = arith.constant 0.000000e+00 : f32
    %12 = vector.broadcast %cst_10 : f32 to vector<8x128xf32>
    %13 = arith.maximumf %11, %12 : vector<8x128xf32>
    %14 = vector.broadcast %cst_10 : f32 to vector<8x128xf32>
    %15 = arith.subf %11, %14 : vector<8x128xf32>
    %16 = arith.cmpf one, %15, %15 : vector<8x128xf32>
    %17 = vector.broadcast %cst_10 : f32 to vector<8x128xf32>
    %18 = arith.addf %11, %17 : vector<8x128xf32>
    %19 = math.absf %15 : vector<8x128xf32>
    %cst_11 = arith.constant 0.000000e+00 : f32
    %20 = vector.broadcast %cst_11 : f32 to vector<8x128xf32>
    %21 = arith.subf %20, %19 : vector<8x128xf32>
    %22 = math.exp %21 : vector<8x128xf32>
    %23 = math.log1p %22 : vector<8x128xf32>
    %24 = arith.addf %13, %23 : vector<8x128xf32>
    %25 = arith.select %16, %18, %24 : vector<8x128xi1>, vector<8x128xf32>
    %26 = tpu.iota {dimensions = array<i32: 1>} : vector<8x128xi32>
    %c8_i32 = arith.constant 8 : i32
    %c0_i32 = arith.constant 0 : i32
    %27 = arith.cmpi eq, %c8_i32, %c0_i32 : i32
    %c1_i32 = arith.constant 1 : i32
    %28 = arith.select %27, %c1_i32, %c8_i32 : i32
    %29 = vector.broadcast %28 : i32 to vector<8x128xi32>
    %30 = arith.remsi %26, %29 : vector<8x128xi32>
    %c0_i32_12 = arith.constant 0 : i32
    %31 = vector.broadcast %c0_i32_12 : i32 to vector<8x128xi32>
    %32 = arith.cmpi ne, %30, %31 : vector<8x128xi32>
    %c0_i32_13 = arith.constant 0 : i32
    %33 = vector.broadcast %c0_i32_13 : i32 to vector<8x128xi32>
    %34 = arith.cmpi slt, %30, %33 : vector<8x128xi32>
    %c0_i32_14 = arith.constant 0 : i32
    %35 = arith.cmpi slt, %28, %c0_i32_14 : i32
    %36 = vector.broadcast %35 : i1 to vector<8x128xi1>
    %37 = vector.broadcast %36 : vector<8x128xi1> to vector<8x128xi1>
    %38 = arith.xori %34, %37 : vector<8x128xi1>
    %39 = arith.andi %38, %32 : vector<8x128xi1>
    %40 = vector.broadcast %28 : i32 to vector<8x128xi32>
    %41 = arith.addi %30, %40 : vector<8x128xi32>
    %42 = arith.select %39, %41, %30 : vector<8x128xi1>, vector<8x128xi32>
    %c7_i32 = arith.constant 7 : i32
    %43 = vector.broadcast %c7_i32 : i32 to vector<8x128xi32>
    %44 = arith.cmpi eq, %42, %43 : vector<8x128xi32>
    %c1_i32_15 = arith.constant 1 : i32
    %45 = tpu.dynamic_rotate %25 by %c1_i32_15 dim 1 : vector<8x128xf32>, i32 -> vector<8x128xf32>
    %46 = arith.maximumf %25, %45 : vector<8x128xf32>
    %c2_i32 = arith.constant 2 : i32
    %47 = tpu.dynamic_rotate %46 by %c2_i32 dim 1 : vector<8x128xf32>, i32 -> vector<8x128xf32>
    %48 = arith.maximumf %46, %47 : vector<8x128xf32>
    %c4_i32 = arith.constant 4 : i32
    %49 = tpu.dynamic_rotate %48 by %c4_i32 dim 1 : vector<8x128xf32>, i32 -> vector<8x128xf32>
    %50 = arith.maximumf %48, %49 : vector<8x128xf32>
    %cst_16 = arith.constant 0.000000e+00 : f32
    %51 = vector.broadcast %cst_16 : f32 to vector<8x128xf32>
    %52 = arith.select %44, %50, %51 : vector<8x128xi1>, vector<8x128xf32>
    %c127_i32 = arith.constant 127 : i32
    %53 = tpu.dynamic_rotate %52 by %c127_i32 dim 1 : vector<8x128xf32>, i32 -> vector<8x128xf32>
    %54 = arith.addf %52, %53 : vector<8x128xf32>
    %c126_i32 = arith.constant 126 : i32
    %55 = tpu.dynamic_rotate %54 by %c126_i32 dim 1 : vector<8x128xf32>, i32 -> vector<8x128xf32>
    %56 = arith.addf %54, %55 : vector<8x128xf32>
    %c124_i32 = arith.constant 124 : i32
    %57 = tpu.dynamic_rotate %56 by %c124_i32 dim 1 : vector<8x128xf32>, i32 -> vector<8x128xf32>
    %58 = arith.addf %56, %57 : vector<8x128xf32>
    %59 = arith.subf %25, %58 : vector<8x128xf32>
    %60 = math.exp %59 : vector<8x128xf32>
    %c1_i32_17 = arith.constant 1 : i32
    %61 = tpu.dynamic_rotate %60 by %c1_i32_17 dim 1 : vector<8x128xf32>, i32 -> vector<8x128xf32>
    %62 = arith.addf %60, %61 : vector<8x128xf32>
    %c2_i32_18 = arith.constant 2 : i32
    %63 = tpu.dynamic_rotate %62 by %c2_i32_18 dim 1 : vector<8x128xf32>, i32 -> vector<8x128xf32>
    %64 = arith.addf %62, %63 : vector<8x128xf32>
    %c4_i32_19 = arith.constant 4 : i32
    %65 = tpu.dynamic_rotate %64 by %c4_i32_19 dim 1 : vector<8x128xf32>, i32 -> vector<8x128xf32>
    %66 = arith.addf %64, %65 : vector<8x128xf32>
    %cst_20 = arith.constant 0.000000e+00 : f32
    %67 = vector.broadcast %cst_20 : f32 to vector<8x128xf32>
    %68 = arith.select %44, %66, %67 : vector<8x128xi1>, vector<8x128xf32>
    %c127_i32_21 = arith.constant 127 : i32
    %69 = tpu.dynamic_rotate %68 by %c127_i32_21 dim 1 : vector<8x128xf32>, i32 -> vector<8x128xf32>
    %70 = arith.addf %68, %69 : vector<8x128xf32>
    %c126_i32_22 = arith.constant 126 : i32
    %71 = tpu.dynamic_rotate %70 by %c126_i32_22 dim 1 : vector<8x128xf32>, i32 -> vector<8x128xf32>
    %72 = arith.addf %70, %71 : vector<8x128xf32>
    %c124_i32_23 = arith.constant 124 : i32
    %73 = tpu.dynamic_rotate %72 by %c124_i32_23 dim 1 : vector<8x128xf32>, i32 -> vector<8x128xf32>
    %74 = arith.addf %72, %73 : vector<8x128xf32>
    %75 = arith.divf %60, %74 : vector<8x128xf32>
    %cst_24 = arith.constant 1.000000e-10 : f32
    %76 = vector.broadcast %cst_24 : f32 to vector<8x128xf32>
    %77 = arith.addf %75, %76 : vector<8x128xf32>
    %78 = math.log %77 : vector<8x128xf32>
    %c0_25 = arith.constant 0 : index
    %c0_26 = arith.constant 0 : index
    %79 = vector.load %arg6[%c0_25, %c0_26] : memref<8x128xf32, #tpu.memory_space<vmem>>, vector<8x128xf32>
    %80 = arith.addf %78, %79 : vector<8x128xf32>
    %cst_27 = arith.constant 1.000000e+01 : f32
    %81 = vector.broadcast %cst_27 : f32 to vector<8x128xf32>
    %82 = arith.mulf %80, %81 : vector<8x128xf32>
    %c1_i32_28 = arith.constant 1 : i32
    %83 = tpu.dynamic_rotate %82 by %c1_i32_28 dim 1 : vector<8x128xf32>, i32 -> vector<8x128xf32>
    %84 = arith.maximumf %82, %83 : vector<8x128xf32>
    %c2_i32_29 = arith.constant 2 : i32
    %85 = tpu.dynamic_rotate %84 by %c2_i32_29 dim 1 : vector<8x128xf32>, i32 -> vector<8x128xf32>
    %86 = arith.maximumf %84, %85 : vector<8x128xf32>
    %c4_i32_30 = arith.constant 4 : i32
    %87 = tpu.dynamic_rotate %86 by %c4_i32_30 dim 1 : vector<8x128xf32>, i32 -> vector<8x128xf32>
    %88 = arith.maximumf %86, %87 : vector<8x128xf32>
    %cst_31 = arith.constant 0.000000e+00 : f32
    %89 = vector.broadcast %cst_31 : f32 to vector<8x128xf32>
    %90 = arith.select %44, %88, %89 : vector<8x128xi1>, vector<8x128xf32>
    %c127_i32_32 = arith.constant 127 : i32
    %91 = tpu.dynamic_rotate %90 by %c127_i32_32 dim 1 : vector<8x128xf32>, i32 -> vector<8x128xf32>
    %92 = arith.addf %90, %91 : vector<8x128xf32>
    %c126_i32_33 = arith.constant 126 : i32
    %93 = tpu.dynamic_rotate %92 by %c126_i32_33 dim 1 : vector<8x128xf32>, i32 -> vector<8x128xf32>
    %94 = arith.addf %92, %93 : vector<8x128xf32>
    %c124_i32_34 = arith.constant 124 : i32
    %95 = tpu.dynamic_rotate %94 by %c124_i32_34 dim 1 : vector<8x128xf32>, i32 -> vector<8x128xf32>
    %96 = arith.addf %94, %95 : vector<8x128xf32>
    %97 = arith.subf %82, %96 : vector<8x128xf32>
    %98 = math.exp %97 : vector<8x128xf32>
    %c1_i32_35 = arith.constant 1 : i32
    %99 = tpu.dynamic_rotate %98 by %c1_i32_35 dim 1 : vector<8x128xf32>, i32 -> vector<8x128xf32>
    %100 = arith.addf %98, %99 : vector<8x128xf32>
    %c2_i32_36 = arith.constant 2 : i32
    %101 = tpu.dynamic_rotate %100 by %c2_i32_36 dim 1 : vector<8x128xf32>, i32 -> vector<8x128xf32>
    %102 = arith.addf %100, %101 : vector<8x128xf32>
    %c4_i32_37 = arith.constant 4 : i32
    %103 = tpu.dynamic_rotate %102 by %c4_i32_37 dim 1 : vector<8x128xf32>, i32 -> vector<8x128xf32>
    %104 = arith.addf %102, %103 : vector<8x128xf32>
    %cst_38 = arith.constant 0.000000e+00 : f32
    %105 = vector.broadcast %cst_38 : f32 to vector<8x128xf32>
    %106 = arith.select %44, %104, %105 : vector<8x128xi1>, vector<8x128xf32>
    %c127_i32_39 = arith.constant 127 : i32
    %107 = tpu.dynamic_rotate %106 by %c127_i32_39 dim 1 : vector<8x128xf32>, i32 -> vector<8x128xf32>
    %108 = arith.addf %106, %107 : vector<8x128xf32>
    %c126_i32_40 = arith.constant 126 : i32
    %109 = tpu.dynamic_rotate %108 by %c126_i32_40 dim 1 : vector<8x128xf32>, i32 -> vector<8x128xf32>
    %110 = arith.addf %108, %109 : vector<8x128xf32>
    %c124_i32_41 = arith.constant 124 : i32
    %111 = tpu.dynamic_rotate %110 by %c124_i32_41 dim 1 : vector<8x128xf32>, i32 -> vector<8x128xf32>
    %112 = arith.addf %110, %111 : vector<8x128xf32>
    %113 = tpu.reciprocal %112 {approx = true} : vector<8x128xf32> -> vector<8x128xf32>
    %114 = arith.mulf %112, %113 : vector<8x128xf32>
    %cst_42 = arith.constant 2.000000e+00 : f32
    %115 = vector.broadcast %cst_42 : f32 to vector<8x128xf32>
    %116 = arith.subf %115, %114 : vector<8x128xf32>
    %117 = arith.mulf %113, %116 : vector<8x128xf32>
    %118 = arith.mulf %98, %117 : vector<8x128xf32>
    %c0_43 = arith.constant 0 : index
    %c0_44 = arith.constant 0 : index
    %119 = vector.load %arg7[%c0_43, %c0_44] : memref<8x128xf32, #tpu.memory_space<vmem>>, vector<8x128xf32>
    tpu.vector_store %arg7[%c0_43, %c0_44], %118 {strides = array<i32>} : memref<8x128xf32, #tpu.memory_space<vmem>>, vector<8x128xf32>,
    %c0_45 = arith.constant 0 : index
    %c0_46 = arith.constant 0 : index
    %120 = vector.load %arg5[%c0_45, %c0_46] : memref<128x32xf32, #tpu.memory_space<vmem>>, vector<128x32xf32>
    %cst_47 = arith.constant dense<0.000000e+00> : vector<8x32xf32>
    %121 = tpu.matmul %118, %120, %cst_47 {dimension_numbers = #tpu.dot_dimension_numbers<[1], [0], [0], [1], [0, 0, 1, 1], [], []>} : vector<8x128xf32>, vector<128x32xf32>, vector<8x32xf32> -> vector<8x32xf32>
    %c0_48 = arith.constant 0 : index
    %c0_49 = arith.constant 0 : index
    %122 = vector.load %arg8[%c0_48, %c0_49] : memref<8x32xf32, #tpu.memory_space<vmem>>, vector<8x32xf32>
    tpu.vector_store %arg8[%c0_48, %c0_49], %121 {strides = array<i32>} : memref<8x32xf32, #tpu.memory_space<vmem>>, vector<8x32xf32>,
    return
  }
}

</mosaic_0001>

<bundles_post_ra>
// kernel: code_ae_forward.1
= control target key start
LH: loop header
LB: loop body
LE: loop exit
PB: predicated region body
PF: predicated region fallthrough
CT: control target
= control target key end

     0   :  { %v631_v3 = vmov 0.0|0.0   ;;  %vm632_vm0 = vmmov 0   ;;  %v633_v6 = vmov 0.0   ;;  %s857_s0 = inlined_call_operand.vmem [shape: f32[8,32], index: 0, kind: input, shape index: {}]   ;;  %s858_s1 = inlined_call_operand.vmem [shape: f32[32,64], index: 1, kind: input, shape index: {}]   ;;  %s859_s2 = inlined_call_operand.vmem [shape: f32[1,64], index: 2, kind: input, shape index: {}]   ;;  %s860_s3 = inlined_call_operand.vmem [shape: f32[64,128], index: 3, kind: input, shape index: {}]   ;;  %s861_s4 = inlined_call_operand.vmem [shape: f32[1,128], index: 4, kind: input, shape index: {}]   ;;  %s862_s5 = inlined_call_operand.vmem [shape: f32[128,32], index: 5, kind: input, shape index: {}]   ;;  %s863_s6 = inlined_call_operand.vmem [shape: f32[8,128], index: 6, kind: input, shape index: {}]   ;;  %s864_s7 = inlined_call_operand.vmem [shape: f32[8,128], index: 7, kind: output, shape index: {0}]   ;;  %s865_s8 = inlined_call_operand.hbm [shape: f32[8,32], index: 8, kind: output, shape index: {1}]  }
   0x1   :  { %v30_v0 = vld [vmem:[%s858_s1] sm:$0xff]  ;;  %v31_v1 = vld [vmem:[%s858_s1 + $0x8] sm:$0xff]  ;;  %v32_v2 = vld [vmem:[%s858_s1 + $0x10] sm:$0xff]  ;;  %539 = vmatprep.subr.bf16.mxu1 %v631_v3  ;;  %482 = vmatprep.mubr.msk.f32.mxu1 %vm632_vm0, %v633_v6 }
   0x2   :  { %v540_v4 = vpack.c.bf16 %v31_v1, %v30_v0  ;;  %v33_v5 = vld [vmem:[%s858_s1 + $0x18] sm:$0xff]  ;;  %557 = vmatprep.subr.bf16.mxu0 %v631_v3  ;;  %536 = vmatprep.mubr.msk.f32.mxu0 %vm632_vm0, %v633_v6 }
   0x3   :  { %14 = vsyncpa [#allocation3], 0  ;;  %v543_v7 = vpack.c.bf16 %v33_v5, %v32_v2  ;;  %v116_v8 = vld [vmem:[%s860_s3] sm:$0xff]  ;;  %v117_v9 = vld [vmem:[%s860_s3 + $0x8] sm:$0xff]  ;;  %vm41_vm1 = vcmask 261120   ;;  %vm131_vm2 = vcmask 523264   ;;  %v223_v49 = vlaneseq }
   0x4   :  { %541 = vmatpush3.bf16.msra.mxu1 %v540_v4  ;;  %v29_v10 = vld [vmem:[%s857_s0] sm:$0xff]  ;;  %v546_v11 = vpack.c.bf16 %v117_v9, %v116_v8  ;;  %v118_v12 = vld [vmem:[%s860_s3 + $0x10] sm:$0xff]  ;;  %v119_v13 = vld [vmem:[%s860_s3 + $0x18] sm:$0xff]  ;;  %s637_s11 = smov 127   ;;  %s638_s12 = smov 126  }
   0x5   :  { %542 = vmatprep.subr.bf16.mxu1 %v631_v3  ;;  %v549_v14 = vpack.c.bf16 %v119_v13, %v118_v12  ;;  %v120_v15 = vld [vmem:[%s860_s3 + $0x20] sm:$0xff]  ;;  %v121_v16 = vld [vmem:[%s860_s3 + $0x28] sm:$0xff]  ;;  %v122_v18 = vld [vmem:[%s860_s3 + $0x30] sm:$0xff]  ;;  %v224_v50 = vand.u32 127, %v223_v49  ;;  %s639_s13 = smov 124   ;;  %s640_s20 = smov [#allocation2]  }
   0x6   :  { %v552_v17 = vpack.c.bf16 %v121_v16, %v120_v15  ;;  %v123_v19 = vld [vmem:[%s860_s3 + $0x38] sm:$0xff]  ;;  %v439_v21 = vld [vmem:[%s859_s2] ss:$0 sm:$0xff]  ;;  %s634_s2 = smov 1   ;;  %s635_s3 = smov 2   ;;  %v339_v53 = vld [vmem:[%s862_s5 + $0x28] sm:$0xff] }
   0x7   :  { %v555_v20 = vpack.c.bf16 %v123_v19, %v122_v18  ;;  %v441_v26 = vld [vmem:[%s861_s4] ss:$0 sm:$0xff]  ;;  %s636_s4 = smov 4   ;;  %v229_v51 = vand.u32 7, %v224_v50  ;;  %v337_v50 = vld [vmem:[%s862_s5 + $0x18] sm:$0xff]  ;;  %s429_s21 = sshll.u32 %s640_s20, 4  ;;  %s430_s21 = int_to_ptr.vmem [resolvable:$true] %s429_s21 }
   0x8   :  { %544 = vmatpush3.bf16.msra.mxu1 %v543_v7  ;;  %v284_v19 = vld [vmem:[%s863_s6] sm:$0xff]  ;;  %p612_p1 = scmp.lt.s32.totalorder %s430_s21, %s430_s21 }
   0x9   :  { %545 = vmatprep.subr.bf16.mxu1 %v631_v3  ;;  %vm745_vm5 = vcmp.eq.s32.totalorder %v229_v51, 7 }
   0xb   :  { %483 = vmatmul.mubr.msk.f32.vlgmr.msra.gmra.mrb[0].mxu1 %vm41_vm1, %v29_v10 }
   0xc   :  { %547 = vmatpush3.bf16.msra.mxu1 %v546_v11  ;;  %501 = vmatprep.mubr.msk.f32.mxu1 %vm632_vm0, %v633_v6 }
   0xd   :  { %548 = vmatprep.subr.bf16.mxu1 %v631_v3 }
  0x10   :  { %550 = vmatpush3.bf16.msra.mxu1 %v549_v14 }
  0x11   :  { %551 = vmatprep.subr.bf16.mxu1 %v631_v3 }
  0x14   :  { %553 = vmatpush3.bf16.msra.mxu1 %v552_v17 }
  0x15   :  { %554 = vmatprep.subr.bf16.mxu1 %v631_v3 }
  0x18   :  { %556 = vmatpush3.bf16.msra.mxu1 %v555_v20 }
  0xde   :  { %v111_v22 = vpop.f32.mrb[0].mxu1 }
  0xdf   :  { %v112_v23 = vadd.f32 %v439_v21, %v111_v22  ;;  %v484_v24 = vpop.f32.mrb[1].mxu1 }
  0xe1   :  { %591 = vtanh.f32 %v112_v23 }
  0xeb   :  { %v592_v25 = vpop.eup %591 }
  0xec   :  { %502 = vmatmul.mubr.msk.f32.vlgmr.msra.gmra.mrb[2].mxu1 %vm131_vm2, %v592_v25 }
 0x1bf   :  { %v201_v27 = vpop.f32.mrb[2].mxu1 }
 0x1c0   :  { %v202_v28 = vadd.f32 %v441_v26, %v201_v27  ;;  %v503_v29 = vpop.f32.mrb[3].mxu1 }
 0x1c2   :  { %v208_v30 = vand.u32 2147483647, %v202_v28  ;;  %v205_v41 = vmax.f32 %v202_v28, 0.0  ;;  %vm206_vm4 = vcmp.ne.f32.partialorder %v202_v28, %v202_v28 }
 0x1c4   :  { %v209_v31 = vsub.f32 0.0, %v208_v30 }
 0x1c6   :  { %v210_v32 = vmul.f32 1.442695, %v209_v31 }
 0x1c8   :  { %593 = vpow2.f32 %v210_v32 }
 0x1d2   :  { %v594_v33 = vpop.eup %593 }
 0x1d3   :  { %v212_v34 = vadd.f32 1.0, %v594_v33  ;;  %v215_v35 = vmul.f32 -0.5, %v594_v33  ;;  %v218_v37 = vand.u32 2147483647, %v594_v33 }
 0x1d5   :  { %595 = vlog2.f32 %v212_v34  ;;  %v216_v36 = vadd.f32 1.0, %v215_v35  ;;  %vm219_vm3 = vcmp.lt.f32.partialorder %v218_v37, 0.0004427343 }
 0x1d7   :  { %v217_v40 = vmul.f32 %v594_v33, %v216_v36 }
 0x1df   :  { %v596_v38 = vpop.eup %595 }
 0x1e0   :  { %v214_v39 = vmul.f32 0.6931472, %v596_v38 }
 0x1e2   :  { %v220_v42 = vsel %vm219_vm3, %v217_v40, %v214_v39 }
 0x1e3   :  { %v221_v43 = vadd.f32 %v220_v42, %v205_v41 }
 0x1e5   :  { %v222_v44 = vsel %vm206_vm4, %v202_v28, %v221_v43 }
 0x1e6   :  { %238 = vrot.lane.b32.xlu0 %v222_v44, %s634_s2 }
 0x258   :  { %v239_v45 = vpop.permute.xlu0 %238 }
 0x259   :  { %v240_v46 = vmax.f32 %v222_v44, %v239_v45 }
 0x25b   :  { %241 = vrot.lane.b32.xlu0 %v240_v46, %s635_s3 }
 0x2cd   :  { %v242_v47 = vpop.permute.xlu0 %241 }
 0x2ce   :  { %v243_v48 = vmax.f32 %v240_v46, %v242_v47  ;;  %v334_v46 = vld [vmem:[%s862_s5] sm:$0xff]  ;;  %v335_v47 = vld [vmem:[%s862_s5 + $0x8] sm:$0xff] }
 0x2cf   :  { %v558_v49 = vpack.c.bf16 %v335_v47, %v334_v46 }
 0x2d0   :  { %244 = vrot.lane.b32.xlu1 %v243_v48, %s636_s4 }
 0x2d1   :  { %559 = vmatpush3.bf16.msra.mxu0 %v558_v49 }
 0x2d2   :  { %560 = vmatprep.subr.bf16.mxu0 %v631_v3 }
 0x342   :  { %v245_v52 = vpop.permute.xlu1 %244 }
 0x343   :  { %v246_v54 = vmax.f32 %v243_v48, %v245_v52  ;;  %v336_v48 = vld [vmem:[%s862_s5 + $0x10] sm:$0xff]  ;;  %v338_v52 = vld [vmem:[%s862_s5 + $0x20] sm:$0xff] }
 0x344   :  { %v561_v51 = vpack.c.bf16 %v337_v50, %v336_v48 }
 0x345   :  { %v247_v55 = vsel %vm745_vm5, %v246_v54, 0.0  ;;  %v564_v54 = vpack.c.bf16 %v339_v53, %v338_v52 }
 0x346   :  { %248 = vrot.lane.b32.xlu1 %v247_v55, %s637_s11  ;;  %562 = vmatpush3.bf16.msra.mxu0 %v561_v51 }
 0x347   :  { %563 = vmatprep.subr.bf16.mxu0 %v631_v3 }
 0x34a   :  { %565 = vmatpush3.bf16.msra.mxu0 %v564_v54 }
 0x34b   :  { %566 = vmatprep.subr.bf16.mxu0 %v631_v3 }
 0x3b8   :  { %v249_v56 = vpop.permute.xlu1 %248 }
 0x3b9   :  { %v250_v57 = vadd.f32 %v249_v56, %v247_v55 }
 0x3bb   :  { %251 = vrot.lane.b32.xlu0 %v250_v57, %s638_s12 }
 0x42d   :  { %v252_v58 = vpop.permute.xlu0 %251 }
 0x42e   :  { %v253_v59 = vadd.f32 %v252_v58, %v250_v57  ;;  %v340_v57 = vld [vmem:[%s862_s5 + $0x30] sm:$0xff]  ;;  %v341_v58 = vld [vmem:[%s862_s5 + $0x38] sm:$0xff] }
 0x430   :  { %254 = vrot.lane.b32.xlu1 %v253_v59, %s639_s13 }
 0x4a2   :  { %v255_v60 = vpop.permute.xlu1 %254 }
 0x4a3   :  { %v256_v61 = vadd.f32 %v255_v60, %v253_v59  ;;  %v567_v59 = vpack.c.bf16 %v341_v58, %v340_v57  ;;  %v342_v60 = vld [vmem:[%s862_s5 + $0x40] sm:$0xff] }
 0x4a5   :  { %v257_v62 = vsub.f32 %v222_v44, %v256_v61  ;;  %568 = vmatpush3.bf16.msra.mxu0 %v567_v59  ;;  %v343_v61 = vld [vmem:[%s862_s5 + $0x48] sm:$0xff] }
 0x4a6   :  { %569 = vmatprep.subr.bf16.mxu0 %v631_v3 }
 0x4a7   :  { %v258_v63 = vmul.f32 1.442695, %v257_v62  ;;  %v570_v62 = vpack.c.bf16 %v343_v61, %v342_v60 }
 0x4a9   :  { %597 = vpow2.f32 %v258_v63  ;;  %571 = vmatpush3.bf16.msra.mxu0 %v570_v62  ;;  %v344_v63 = vld [vmem:[%s862_s5 + $0x50] sm:$0xff] }
 0x4aa   :  { %572 = vmatprep.subr.bf16.mxu0 %v631_v3 }
 0x4b3   :  { %v598_v0 = vpop.eup %597 }
 0x4b4   :  { %260 = vrot.lane.b32.xlu0 %v598_v0, %s634_s2 }
 0x526   :  { %v261_v1 = vpop.permute.xlu0 %260 }
 0x527   :  { %v262_v2 = vadd.f32 %v598_v0, %v261_v1 }
 0x529   :  { %263 = vrot.lane.b32.xlu1 %v262_v2, %s635_s3 }
 0x59b   :  { %v264_v4 = vpop.permute.xlu1 %263 }
 0x59c   :  { %v265_v5 = vadd.f32 %v264_v4, %v262_v2 }
 0x59e   :  { %266 = vrot.lane.b32.xlu0 %v265_v5, %s636_s4 }
 0x610   :  { %v267_v6 = vpop.permute.xlu0 %266 }
 0x611   :  { %v268_v7 = vadd.f32 %v267_v6, %v265_v5  ;;  %v346_v5 = vld [vmem:[%s862_s5 + $0x60] sm:$0xff]  ;;  %v347_v6 = vld [vmem:[%s862_s5 + $0x68] sm:$0xff] }
 0x613   :  { %v269_v8 = vsel %vm745_vm5, %v268_v7, 0.0  ;;  %v576_v7 = vpack.c.bf16 %v347_v6, %v346_v5 }
 0x614   :  { %270 = vrot.lane.b32.xlu1 %v269_v8, %s637_s11 }
 0x686   :  { %v271_v9 = vpop.permute.xlu1 %270 }
 0x687   :  { %v272_v10 = vadd.f32 %v271_v9, %v269_v8  ;;  %v348_v8 = vld [vmem:[%s862_s5 + $0x70] sm:$0xff]  ;;  %v349_v9 = vld [vmem:[%s862_s5 + $0x78] sm:$0xff] }
 0x689   :  { %273 = vrot.lane.b32.xlu0 %v272_v10, %s638_s12 }
 0x6fb   :  { %v274_v11 = vpop.permute.xlu0 %273 }
 0x6fc   :  { %v275_v12 = vadd.f32 %v274_v11, %v272_v10  ;;  %v579_v10 = vpack.c.bf16 %v349_v9, %v348_v8 }
 0x6fe   :  { %276 = vrot.lane.b32.xlu1 %v275_v12, %s639_s13 }
 0x770   :  { %v277_v13 = vpop.permute.xlu1 %276 }
 0x771   :  { %v278_v14 = vadd.f32 %v277_v13, %v275_v12 }
 0x773   :  { %599 = vrcp.f32 %v278_v14 }
 0x77d   :  { %v600_v15 = vpop.eup %599 }
 0x77e   :  { %v280_v16 = vmul.f32 %v600_v15, %v598_v0  ;;  %v345_v0 = vld [vmem:[%s862_s5 + $0x58] sm:$0xff]  ;;  %s607_s5 = scalar_lea.vmem %s430_s21, 128 }
 0x77f   :  { %v573_v1 = vpack.c.bf16 %v345_v0, %v344_v63  ;;  %p608_p0 = scmp.ne.s32.totalorder %s430_s21, %s607_s5  ;;  %p613_p2 = scmp.lt.s32.totalorder %s607_s5, %s607_s5 }
 0x780   :  { %v281_v17 = vadd.f32 1e-10, %v280_v16 }
 0x781   :  { %574 = vmatpush3.bf16.msra.mxu0 %v573_v1  ;;  %p614_p3 = por %p613_p2, %p612_p1 }
 0x782   :  { %601 = vlog2.f32 %v281_v17  ;;  %575 = vmatprep.subr.bf16.mxu0 %v631_v3 }
 0x783   :  { %p615_p4 = pnand %p614_p3, %p608_p0 }
 0x785   :  { %577 = vmatpush3.bf16.msra.mxu0 %v576_v7 }
 0x786   :  { %578 = vmatprep.subr.bf16.mxu0 %v631_v3 }
 0x789   :  { %580 = vmatpush3.bf16.msra.mxu0 %v579_v10 }
 0x78c   :  { %v602_v18 = vpop.eup %601 }
 0x78d   :  { %v283_v20 = vmul.f32 0.6931472, %v602_v18 }
 0x78f   :  { %v285_v21 = vadd.f32 %v284_v19, %v283_v20 }
 0x791   :  { %v286_v22 = vmul.f32 10.0, %v285_v21 }
 0x793   :  { %287 = vrot.lane.b32.xlu0 %v286_v22, %s634_s2 }
 0x805   :  { %v288_v23 = vpop.permute.xlu0 %287 }
 0x806   :  { %v289_v24 = vmax.f32 %v286_v22, %v288_v23 }
 0x808   :  { %290 = vrot.lane.b32.xlu1 %v289_v24, %s635_s3 }
 0x87a   :  { %v291_v25 = vpop.permute.xlu1 %290 }
 0x87b   :  { %v292_v26 = vmax.f32 %v289_v24, %v291_v25 }
 0x87d   :  { %293 = vrot.lane.b32.xlu0 %v292_v26, %s636_s4 }
 0x8ef   :  { %v294_v27 = vpop.permute.xlu0 %293 }
 0x8f0   :  { %v295_v28 = vmax.f32 %v292_v26, %v294_v27 }
 0x8f2   :  { %v296_v29 = vsel %vm745_vm5, %v295_v28, 0.0 }
 0x8f3   :  { %297 = vrot.lane.b32.xlu1 %v296_v29, %s637_s11 }
 0x965   :  { %v298_v30 = vpop.permute.xlu1 %297 }
 0x966   :  { %v299_v31 = vadd.f32 %v298_v30, %v296_v29 }
 0x968   :  { %300 = vrot.lane.b32.xlu0 %v299_v31, %s638_s12 }
 0x9da   :  { %v301_v32 = vpop.permute.xlu0 %300 }
 0x9db   :  { %v302_v33 = vadd.f32 %v301_v32, %v299_v31 }
 0x9dd   :  { %303 = vrot.lane.b32.xlu1 %v302_v33, %s639_s13 }
 0xa4f   :  { %v304_v34 = vpop.permute.xlu1 %303 }
 0xa50   :  { %v305_v35 = vadd.f32 %v304_v34, %v302_v33 }
 0xa52   :  { %v306_v36 = vsub.f32 %v286_v22, %v305_v35 }
 0xa54   :  { %v307_v37 = vmul.f32 1.442695, %v306_v36 }
 0xa56   :  { %603 = vpow2.f32 %v307_v37 }
 0xa60   :  { %v773_v38 = vpop.eup %603 }
 0xa61   :  { %309 = vrot.lane.b32.xlu0 %v773_v38, %s634_s2 }
 0xad3   :  { %v310_v39 = vpop.permute.xlu0 %309 }
 0xad4   :  { %v311_v40 = vadd.f32 %v773_v38, %v310_v39 }
 0xad6   :  { %312 = vrot.lane.b32.xlu1 %v311_v40, %s635_s3 }
 0xb48   :  { %v313_v41 = vpop.permute.xlu1 %312 }
 0xb49   :  { %v314_v42 = vadd.f32 %v313_v41, %v311_v40 }
 0xb4b   :  { %315 = vrot.lane.b32.xlu0 %v314_v42, %s636_s4 }
 0xbbd   :  { %v316_v43 = vpop.permute.xlu0 %315 }
 0xbbe   :  { %v317_v44 = vadd.f32 %v316_v43, %v314_v42 }
 0xbc0   :  { %v318_v45 = vsel %vm745_vm5, %v317_v44, 0.0 }
 0xbc1   :  { %319 = vrot.lane.b32.xlu1 %v318_v45, %s637_s11 }
 0xc33   :  { %v320_v55 = vpop.permute.xlu1 %319 }
 0xc34   :  { %v321_v56 = vadd.f32 %v320_v55, %v318_v45 }
 0xc36   :  { %322 = vrot.lane.b32.xlu0 %v321_v56, %s638_s12 }
 0xca8   :  { %v323_v2 = vpop.permute.xlu0 %322 }
 0xca9   :  { %v324_v4 = vadd.f32 %v323_v2, %v321_v56 }
 0xcab   :  { %325 = vrot.lane.b32.xlu1 %v324_v4, %s639_s13 }
 0xd1d   :  { %v326_v11 = vpop.permute.xlu1 %325 }
 0xd1e   :  { %v327_v12 = vadd.f32 %v326_v11, %v324_v4 }
 0xd20   :  { %605 = vrcp.f32 %v327_v12 }
 0xd2a   :  { %v606_v13 = vpop.eup %605 }
 0xd2b   :  { %v329_v14 = vmul.f32 %v606_v13, %v327_v12 }
 0xd2d   :  { %v330_v15 = vsub.f32 2.0, %v329_v14 }
 0xd2f   :  { %v331_v16 = vmul.f32 %v606_v13, %v330_v15 }
 0xd31   :  { %v332_v17 = vmul.f32 %v773_v38, %v331_v16 }
 0xd33   :  { %333 = vst [vmem:[%s864_s7] sm:$0xff] %v332_v17  ;;  %537 = vmatmul.mubr.f32.vlgmr.msra.gmra.mrb[0].mxu0 %v332_v17 }
 0xe06   :  { %v416_v3 = vpop.f32.mrb[0].mxu0 }
 0xe07   :  { %420 = vst.msk [vmem:[#allocation2] sm:$0xff] %vm41_vm1, %v416_v3  ;;  %v538_v18 = vpop.f32.mrb[1].mxu0 }
 0xe08   :  { %618 = shalt.err (!%p615_p4)
}
 0xe09   :  { %s619_s23 = scalar_lea.hbm %s865_s8, 128 }
 0xe0a   :  { %p620_p5 = scmp.ne.s32.totalorder %s865_s8, %s619_s23  ;;  %p623_p6 = scmp.lt.u32.totalorder %s619_s23, %s865_s8 }
 0xe0c   :  { %p625_p7 = pnand %p623_p6, %p620_p5 }
 0xe0e   :  { %628 = shalt.err (!%p625_p7)
}
 0xe0f   :  { %432 = dma.vmem_to_hbm [thread:$0]  %s430_s21, 128, %s865_s8, [#allocation3]  }
 0xe10   :  { %629 = dma.done.wait [#allocation3], 128  }
 0xe11   :  { %630 = vsyncadd [#allocation3], 4294967168 }
 0xe12   :  { %438 = vsyncpa [#allocation3], 1 }

</bundles_post_ra>
